<compile_context>
chip_gen: v5e
topology: v5e:2x2
jax: 0.10.0
libtpu: 0.0.40
codegen_flags: <defaults>
</compile_context>

<pallas_src>
import functools

import jax
import jax.numpy as jnp
from jax import lax
from jax.experimental import pallas as pl
from jax.experimental.pallas import tpu as pltpu


def _subpixel_conv_kernel(x_ref, w_ref, b_ref, o_ref, xpad_ref, stack_ref, *, W):
    """Fused nearest-upsample + 3x3 conv (sub-pixel form) for one image.

    x_ref:     (1, C, H*W)      original-resolution image, spatial flattened on lanes
    w_ref:     (P, 9*C)         phase-combined weights, P = Co*f*f, K = 9*C (bf16)
    b_ref:     (P, 1)           bias per (co, phase) row (f32)
    o_ref:     (1, P, H*W)      output, spatial on lanes
    xpad_ref:  (C, (H+2)*W+2)   VMEM scratch: zero-padded image, (row, col) flattened
    stack_ref: (9*C, H*W)       VMEM scratch: tap-stacked MXU operand
    """
    C = x_ref.shape[1]
    HW = x_ref.shape[2]
    L = xpad_ref.shape[1]

    # Zero-pad rows (plus a +/-1 flat guard) once into VMEM -- no HBM pad copies.
    xpad_ref[...] = jnp.zeros(xpad_ref.shape, xpad_ref.dtype)
    xpad_ref[:, W + 1:W + 1 + HW] = x_ref[0]
    xp = xpad_ref[...]

    # Column-wraparound masks, applied ONCE per dc-column variant (all 3 dr taps
    # of a column share the same masked source).  Row boundaries are handled by
    # the physical zero padding above; only left/right wraparound needs masking.
    colmod = lax.broadcasted_iota(jnp.int32, (C, L), 1) % W
    zeros = jnp.zeros_like(xp)
    x_dc0 = jnp.where(colmod == 0, zeros, xp)   # taps reading the left neighbour
    x_dc2 = jnp.where(colmod == 1, zeros, xp)   # taps reading the right neighbour
    variants = (x_dc0, xp, x_dc2)

    # Every 3x3 tap is a contiguous lane window of the padded image; stack all 9
    # taps along the contraction axis (K = 9*C) in a VMEM scratch so a single
    # MXU dot consumes them (bounds live slab temporaries as well).
    for dr in range(3):
        for dc in range(3):
            t = dr * 3 + dc
            start = dr * W + dc
            stack_ref[t * C:(t + 1) * C, :] = variants[dc][:, start:start + HW]

    # One accumulating MXU dot: (P, 9C) x (9C, HW), bf16 inputs, f32 accumulation.
    acc = jnp.dot(w_ref[...], stack_ref[...].astype(w_ref.dtype),
                  preferred_element_type=jnp.float32)
    acc = acc + b_ref[...]
    o_ref[0] = acc.astype(o_ref.dtype)


def upsample_forward(x_nchw, weight_oihw, bias, factor=2,
                     compute_dtype=jnp.bfloat16):
    """Equivalent of UpSample.forward (nearest x`factor` upsample -> Conv2d(C,C,3,pad=1)).

    x_nchw:      (N, C, H, W)
    weight_oihw: (C, C, 3, 3)   PyTorch Conv2d weight layout
    bias:        (C,)
    returns:     (N, C, H*factor, W*factor)
    """
    N, C, H, W = x_nchw.shape
    Co, Ci, KH, KW = weight_oihw.shape
    assert (Co, Ci, KH, KW) == (C, C, 3, 3)
    f = int(factor)
    P = Co * f * f
    HW = H * W
    L = (H + 2) * W + 2

    # --- sub-pixel weight transform (tiny, plain JAX, done once) -------------------
    # Output phase (pi, pj): tap (kh, kw) of the original kernel reads the padded
    # ORIGINAL image at row/col offset M[p][k] = (p + k - 1)//f + 1 in {0, 1, 2}.
    w_t = jnp.transpose(weight_oihw, (2, 3, 0, 1))                  # (3,3,Co,Ci)
    M = [[(p + k - 1) // f + 1 for k in range(3)] for p in range(f)]
    K3 = jnp.zeros((f, f, 3, 3, Co, Ci), weight_oihw.dtype)
    for pi in range(f):
        for pj in range(f):
            for kh in range(3):
                for kw in range(3):
                    K3 = K3.at[pi, pj, M[pi][kh], M[pj][kw]].add(w_t[kh, kw])
    # Rows: (co, pi, pj)-major channel-phases (cheaper final shuffle);
    # cols: (tap, ci)-major contraction axis of length 9*Ci.
    w_k = jnp.transpose(K3, (4, 0, 1, 2, 3, 5)).reshape(P, 9 * Ci).astype(compute_dtype)
    b_k = jnp.repeat(bias, f * f).reshape(P, 1).astype(jnp.float32)

    # --- input glue: a free reshape only (zero padding happens in VMEM in-kernel) --
    x_flat = x_nchw.reshape(N, C, HW)

    itemsize = x_nchw.dtype.itemsize
    cbytes = jnp.dtype(compute_dtype).itemsize
    flops = 2 * N * HW * 9 * Ci * P
    bytes_accessed = (x_flat.size * itemsize + w_k.size * cbytes
                      + b_k.size * 4 + N * P * HW * itemsize)

    # VMEM budget: double-buffered in/out blocks + single-buffered weights +
    # in-kernel scratch/temporaries, clamped to the device's VMEM capacity.
    block_bytes = (2 * C * HW * itemsize                 # input block (x2 buffers)
                   + 2 * P * HW * itemsize               # output block (x2 buffers)
                   + P * 9 * Ci * cbytes + P * 4         # weights + bias
                   + (4 * C * L + 9 * C * HW) * 4        # pad scratch + mask variants + stack
                   + P * HW * 4 + 9 * C * HW * cbytes)   # f32 accumulator + bf16 operand
    try:
        vmem_cap = int(pltpu.get_tpu_info().vmem_capacity_bytes)
    except Exception:
        vmem_cap = 64 * 1024 * 1024     # conservative (v7x-sized) if query unavailable
    vmem_limit = int(min(int(0.9 * vmem_cap),
                         max(32 * 1024 * 1024, 2 * block_bytes)))

    kernel = functools.partial(_subpixel_conv_kernel, W=W)
    out_shape = jax.ShapeDtypeStruct((N, P, HW), x_nchw.dtype)
    x_spec = pl.BlockSpec((1, C, HW), lambda n: (n, 0, 0))
    o_spec = pl.BlockSpec((1, P, HW), lambda n: (n, 0, 0))
    scratch = [pltpu.VMEM((C, L), x_nchw.dtype),
               pltpu.VMEM((9 * C, HW), x_nchw.dtype)]
    params = pltpu.CompilerParams(dimension_semantics=("parallel",),
                                  vmem_limit_bytes=vmem_limit)
    cost = pl.CostEstimate(flops=flops, transcendentals=0,
                           bytes_accessed=bytes_accessed)

    def run(single_buffer_consts):
        if single_buffer_consts:
            # Grid-invariant blocks: double-buffering them only wastes VMEM.
            w_spec = pl.BlockSpec((P, 9 * Ci), lambda n: (0, 0),
                                  pipeline_mode=pl.Buffered(buffer_count=1))
            b_spec = pl.BlockSpec((P, 1), lambda n: (0, 0),
                                  pipeline_mode=pl.Buffered(buffer_count=1))
        else:
            w_spec = pl.BlockSpec((P, 9 * Ci), lambda n: (0, 0))
            b_spec = pl.BlockSpec((P, 1), lambda n: (0, 0))
        return pl.pallas_call(
            kernel,
            out_shape=out_shape,
            grid=(N,),
            in_specs=[x_spec, w_spec, b_spec],
            out_specs=o_spec,
            scratch_shapes=scratch,
            compiler_params=params,
            cost_estimate=cost,
        )(x_flat, w_k, b_k)

    try:
        out_flat = run(True)
    except Exception:
        # Fallback for jax/Mosaic versions without single-buffer pipeline_mode.
        out_flat = run(False)

    # --- pixel shuffle to NCHW.  P is (co, pi, pj)-major so channels stay outermost.
    # TODO(synk): fuse this shuffle into the consumer (full read+write at f^2 size).
    out = out_flat.reshape(N, Co, f, f, H, W)
    out = jnp.transpose(out, (0, 1, 4, 2, 5, 3)).reshape(N, Co, H * f, W * f)
    return out


def _reference(x_nchw, weight_oihw, bias, factor=2):
    """Pure-JAX reference (nearest upsample + conv) for correctness check."""
    x_up = jnp.repeat(jnp.repeat(x_nchw, factor, axis=2), factor, axis=3)
    out = jax.lax.conv_general_dilated(
        x_up, weight_oihw, window_strides=(1, 1),
        padding=((1, 1), (1, 1)),
        dimension_numbers=("NCHW", "OIHW", "NCHW"))
    return out + bias[None, :, None, None]


if __name__ == "__main__":
    N, C, H, W = 2, 4, 16, 16
    factor = 2

    key = jax.random.PRNGKey(0)
    kx, kw, kb = jax.random.split(key, 3)

    x = jax.random.normal(kx, (N, C, H, W), dtype=jnp.float32)

    # Deterministic Conv2d(channels, channels, 3, padding=1) parameters,
    # PyTorch-style uniform(-1/sqrt(fan_in), 1/sqrt(fan_in)) init.
    fan_in = C * 3 * 3
    bound = 1.0 / (fan_in ** 0.5)
    weight = jax.random.uniform(kw, (C, C, 3, 3), jnp.float32, -bound, bound)
    bias = jax.random.uniform(kb, (C,), jnp.float32, -bound, bound)

    out = jax.block_until_ready(upsample_forward(x, weight, bias, factor=factor))
    ref = jax.block_until_ready(_reference(x, weight, bias, factor=factor))

    assert out.shape == (N, C, H * factor, W * factor), out.shape
    err = jnp.max(jnp.abs(out - ref))
    # bf16 matmul operands (f32 accumulation) -> looser tolerance than the f32 path.
    assert jnp.allclose(out, ref, atol=3e-2, rtol=3e-2), f"max err {err}"

    print("KERNEL_OK")
</pallas_src>

<mosaic_0001>
module attributes {stable_mosaic.version = 11 : i64} {
  func.func @_subpixel_conv_kernel(%arg0: i32, %arg1: memref<1x4x256xf32, #tpu.memory_space<vmem>>, %arg2: memref<16x36xbf16, #tpu.memory_space<vmem>>, %arg3: memref<16x1xf32, #tpu.memory_space<vmem>>, %arg4: memref<1x16x256xf32, #tpu.memory_space<vmem>>, %arg5: memref<4x290xf32, #tpu.memory_space<vmem>>, %arg6: memref<36x256xf32, #tpu.memory_space<vmem>>) attributes {dimension_semantics = [#tpu.dimension_semantics<parallel>], iteration_bounds = array<i64: 2>, scalar_prefetch = 0 : i64, scratch_operands = 2 : i64, tpu.core_type = #tpu.core_type<tc>, window_params = [{transform_indices = @transform_0, window_bounds = array<i64: 1, 4, 256>}, {pipeline_mode = #tpu.pipeline_mode<synchronous>, transform_indices = @transform_1, window_bounds = array<i64: 16, 36>}, {pipeline_mode = #tpu.pipeline_mode<synchronous>, transform_indices = @transform_2, window_bounds = array<i64: 16, 1>}, {transform_indices = @transform_3, window_bounds = array<i64: 1, 16, 256>}]} {
    %cst = arith.constant 0.000000e+00 : f32
    %0 = vector.broadcast %cst : f32 to vector<4x290xf32>
    %c0 = arith.constant 0 : index
    %c0_0 = arith.constant 0 : index
    %1 = vector.load %arg5[%c0, %c0_0] : memref<4x290xf32, #tpu.memory_space<vmem>>, vector<4x290xf32>
    tpu.vector_store %arg5[%c0, %c0_0], %0 {strides = array<i32>} : memref<4x290xf32, #tpu.memory_space<vmem>>, vector<4x290xf32>,
    %c0_1 = arith.constant 0 : index
    %c0_2 = arith.constant 0 : index
    %c0_3 = arith.constant 0 : index
    %2 = vector.load %arg1[%c0_1, %c0_2, %c0_3] : memref<1x4x256xf32, #tpu.memory_space<vmem>>, vector<1x4x256xf32>
    %3 = vector.shape_cast %2 : vector<1x4x256xf32> to vector<4x256xf32>
    %c0_4 = arith.constant 0 : index
    %c17 = arith.constant 17 : index
    %4 = vector.load %arg5[%c0_4, %c17] : memref<4x290xf32, #tpu.memory_space<vmem>>, vector<4x256xf32>
    tpu.vector_store %arg5[%c0_4, %c17], %3 {strides = array<i32>} : memref<4x290xf32, #tpu.memory_space<vmem>>, vector<4x256xf32>,
    %c0_5 = arith.constant 0 : index
    %c0_6 = arith.constant 0 : index
    %5 = vector.load %arg5[%c0_5, %c0_6] : memref<4x290xf32, #tpu.memory_space<vmem>>, vector<4x290xf32>
    %6 = tpu.iota {dimensions = array<i32: 1>} : vector<4x290xi32>
    %c16_i32 = arith.constant 16 : i32
    %c0_i32 = arith.constant 0 : i32
    %7 = arith.cmpi eq, %c16_i32, %c0_i32 : i32
    %c1_i32 = arith.constant 1 : i32
    %8 = arith.select %7, %c1_i32, %c16_i32 : i32
    %9 = vector.broadcast %8 : i32 to vector<4x290xi32>
    %10 = arith.remsi %6, %9 : vector<4x290xi32>
    %c0_i32_7 = arith.constant 0 : i32
    %11 = vector.broadcast %c0_i32_7 : i32 to vector<4x290xi32>
    %12 = arith.cmpi ne, %10, %11 : vector<4x290xi32>
    %c0_i32_8 = arith.constant 0 : i32
    %13 = vector.broadcast %c0_i32_8 : i32 to vector<4x290xi32>
    %14 = arith.cmpi slt, %10, %13 : vector<4x290xi32>
    %c0_i32_9 = arith.constant 0 : i32
    %15 = arith.cmpi slt, %8, %c0_i32_9 : i32
    %16 = vector.broadcast %15 : i1 to vector<4x290xi1>
    %17 = vector.broadcast %16 : vector<4x290xi1> to vector<4x290xi1>
    %18 = arith.xori %14, %17 : vector<4x290xi1>
    %19 = arith.andi %18, %12 : vector<4x290xi1>
    %20 = vector.broadcast %8 : i32 to vector<4x290xi32>
    %21 = arith.addi %10, %20 : vector<4x290xi32>
    %22 = arith.select %19, %21, %10 : vector<4x290xi1>, vector<4x290xi32>
    %cst_10 = arith.constant 0.000000e+00 : f32
    %23 = vector.broadcast %cst_10 : f32 to vector<4x290xf32>
    %c0_i32_11 = arith.constant 0 : i32
    %24 = vector.broadcast %c0_i32_11 : i32 to vector<4x290xi32>
    %25 = arith.cmpi eq, %22, %24 : vector<4x290xi32>
    %26 = arith.select %25, %23, %5 : vector<4x290xi1>, vector<4x290xf32>
    %c1_i32_12 = arith.constant 1 : i32
    %27 = vector.broadcast %c1_i32_12 : i32 to vector<4x290xi32>
    %28 = arith.cmpi eq, %22, %27 : vector<4x290xi32>
    %29 = arith.select %28, %23, %5 : vector<4x290xi1>, vector<4x290xf32>
    %30 = vector.extract_strided_slice %26 {offsets = [0, 0], sizes = [4, 256], strides = [1, 1]} : vector<4x290xf32> to vector<4x256xf32>
    %c0_13 = arith.constant 0 : index
    %c0_14 = arith.constant 0 : index
    %31 = vector.load %arg6[%c0_13, %c0_14] : memref<36x256xf32, #tpu.memory_space<vmem>>, vector<4x256xf32>
    tpu.vector_store %arg6[%c0_13, %c0_14], %30 {strides = array<i32>} : memref<36x256xf32, #tpu.memory_space<vmem>>, vector<4x256xf32>,
    %32 = vector.extract_strided_slice %5 {offsets = [0, 1], sizes = [4, 256], strides = [1, 1]} : vector<4x290xf32> to vector<4x256xf32>
    %c4 = arith.constant 4 : index
    %c0_15 = arith.constant 0 : index
    %33 = vector.load %arg6[%c4, %c0_15] : memref<36x256xf32, #tpu.memory_space<vmem>>, vector<4x256xf32>
    tpu.vector_store %arg6[%c4, %c0_15], %32 {strides = array<i32>} : memref<36x256xf32, #tpu.memory_space<vmem>>, vector<4x256xf32>,
    %34 = vector.extract_strided_slice %29 {offsets = [0, 2], sizes = [4, 256], strides = [1, 1]} : vector<4x290xf32> to vector<4x256xf32>
    %c8 = arith.constant 8 : index
    %c0_16 = arith.constant 0 : index
    %35 = vector.load %arg6[%c8, %c0_16] : memref<36x256xf32, #tpu.memory_space<vmem>>, vector<4x256xf32>
    tpu.vector_store %arg6[%c8, %c0_16], %34 {strides = array<i32>} : memref<36x256xf32, #tpu.memory_space<vmem>>, vector<4x256xf32>,
    %36 = vector.extract_strided_slice %26 {offsets = [0, 16], sizes = [4, 256], strides = [1, 1]} : vector<4x290xf32> to vector<4x256xf32>
    %c12 = arith.constant 12 : index
    %c0_17 = arith.constant 0 : index
    %37 = vector.load %arg6[%c12, %c0_17] : memref<36x256xf32, #tpu.memory_space<vmem>>, vector<4x256xf32>
    tpu.vector_store %arg6[%c12, %c0_17], %36 {strides = array<i32>} : memref<36x256xf32, #tpu.memory_space<vmem>>, vector<4x256xf32>,
    %38 = vector.extract_strided_slice %5 {offsets = [0, 17], sizes = [4, 256], strides = [1, 1]} : vector<4x290xf32> to vector<4x256xf32>
    %c16 = arith.constant 16 : index
    %c0_18 = arith.constant 0 : index
    %39 = vector.load %arg6[%c16, %c0_18] : memref<36x256xf32, #tpu.memory_space<vmem>>, vector<4x256xf32>
    tpu.vector_store %arg6[%c16, %c0_18], %38 {strides = array<i32>} : memref<36x256xf32, #tpu.memory_space<vmem>>, vector<4x256xf32>,
    %40 = vector.extract_strided_slice %29 {offsets = [0, 18], sizes = [4, 256], strides = [1, 1]} : vector<4x290xf32> to vector<4x256xf32>
    %c20 = arith.constant 20 : index
    %c0_19 = arith.constant 0 : index
    %41 = vector.load %arg6[%c20, %c0_19] : memref<36x256xf32, #tpu.memory_space<vmem>>, vector<4x256xf32>
    tpu.vector_store %arg6[%c20, %c0_19], %40 {strides = array<i32>} : memref<36x256xf32, #tpu.memory_space<vmem>>, vector<4x256xf32>,
    %42 = vector.extract_strided_slice %26 {offsets = [0, 32], sizes = [4, 256], strides = [1, 1]} : vector<4x290xf32> to vector<4x256xf32>
    %c24 = arith.constant 24 : index
    %c0_20 = arith.constant 0 : index
    %43 = vector.load %arg6[%c24, %c0_20] : memref<36x256xf32, #tpu.memory_space<vmem>>, vector<4x256xf32>
    tpu.vector_store %arg6[%c24, %c0_20], %42 {strides = array<i32>} : memref<36x256xf32, #tpu.memory_space<vmem>>, vector<4x256xf32>,
    %44 = vector.extract_strided_slice %5 {offsets = [0, 33], sizes = [4, 256], strides = [1, 1]} : vector<4x290xf32> to vector<4x256xf32>
    %c28 = arith.constant 28 : index
    %c0_21 = arith.constant 0 : index
    %45 = vector.load %arg6[%c28, %c0_21] : memref<36x256xf32, #tpu.memory_space<vmem>>, vector<4x256xf32>
    tpu.vector_store %arg6[%c28, %c0_21], %44 {strides = array<i32>} : memref<36x256xf32, #tpu.memory_space<vmem>>, vector<4x256xf32>,
    %46 = vector.extract_strided_slice %29 {offsets = [0, 34], sizes = [4, 256], strides = [1, 1]} : vector<4x290xf32> to vector<4x256xf32>
    %c32 = arith.constant 32 : index
    %c0_22 = arith.constant 0 : index
    %47 = vector.load %arg6[%c32, %c0_22] : memref<36x256xf32, #tpu.memory_space<vmem>>, vector<4x256xf32>
    tpu.vector_store %arg6[%c32, %c0_22], %46 {strides = array<i32>} : memref<36x256xf32, #tpu.memory_space<vmem>>, vector<4x256xf32>,
    %c0_23 = arith.constant 0 : index
    %c0_24 = arith.constant 0 : index
    %48 = vector.load %arg2[%c0_23, %c0_24] : memref<16x36xbf16, #tpu.memory_space<vmem>>, vector<16x36xbf16>
    %c0_25 = arith.constant 0 : index
    %c0_26 = arith.constant 0 : index
    %49 = vector.load %arg6[%c0_25, %c0_26] : memref<36x256xf32, #tpu.memory_space<vmem>>, vector<36x256xf32>
    %50 = arith.truncf %49 : vector<36x256xf32> to vector<36x256xbf16>
    %cst_27 = arith.constant dense<0.000000e+00> : vector<16x256xf32>
    %51 = tpu.matmul %48, %50, %cst_27 {dimension_numbers = #tpu.dot_dimension_numbers<[1], [0], [0], [1], [0, 0, 1, 1], [], []>} : vector<16x36xbf16>, vector<36x256xbf16>, vector<16x256xf32> -> vector<16x256xf32>
    %c0_28 = arith.constant 0 : index
    %c0_29 = arith.constant 0 : index
    %52 = vector.load %arg3[%c0_28, %c0_29] : memref<16x1xf32, #tpu.memory_space<vmem>>, vector<16x1xf32>
    %53 = vector.broadcast %52 : vector<16x1xf32> to vector<16x256xf32>
    %54 = arith.addf %51, %53 : vector<16x256xf32>
    %c0_30 = arith.constant 0 : index
    %c0_31 = arith.constant 0 : index
    %c0_32 = arith.constant 0 : index
    %55 = vector.load %arg4[%c0_30, %c0_31, %c0_32] : memref<1x16x256xf32, #tpu.memory_space<vmem>>, vector<1x16x256xf32>
    %56 = vector.shape_cast %55 : vector<1x16x256xf32> to vector<16x256xf32>
    %57 = vector.shape_cast %54 : vector<16x256xf32> to vector<1x16x256xf32>
    tpu.vector_store %arg4[%c0_30, %c0_31, %c0_32], %57 {strides = array<i32>} : memref<1x16x256xf32, #tpu.memory_space<vmem>>, vector<1x16x256xf32>,
    return
  }
  func.func @transform_0(%arg0: i32) -> (i32, i32, i32) {
    %c0_i32 = arith.constant 0 : i32
    %c0_i32_0 = arith.constant 0 : i32
    %c0_i32_1 = arith.constant 0 : i32
    return %arg0, %c0_i32, %c0_i32_0 : i32, i32, i32
  }
  func.func @transform_1(%arg0: i32) -> (i32, i32) {
    %c0_i32 = arith.constant 0 : i32
    %c0_i32_0 = arith.constant 0 : i32
    %c0_i32_1 = arith.constant 0 : i32
    return %c0_i32, %c0_i32_0 : i32, i32
  }
  func.func @transform_2(%arg0: i32) -> (i32, i32) {
    %c0_i32 = arith.constant 0 : i32
    %c0_i32_0 = arith.constant 0 : i32
    %c0_i32_1 = arith.constant 0 : i32
    return %c0_i32, %c0_i32_0 : i32, i32
  }
  func.func @transform_3(%arg0: i32) -> (i32, i32, i32) {
    %c0_i32 = arith.constant 0 : i32
    %c0_i32_0 = arith.constant 0 : i32
    %c0_i32_1 = arith.constant 0 : i32
    return %arg0, %c0_i32, %c0_i32_0 : i32, i32, i32
  }
}

module attributes {stable_mosaic.version = 11 : i64} {
  func.func @_subpixel_conv_kernel(%arg0: i32, %arg1: memref<1x4x256xf32, #tpu.memory_space<vmem>>, %arg2: memref<16x36xbf16, #tpu.memory_space<vmem>>, %arg3: memref<16x1xf32, #tpu.memory_space<vmem>>, %arg4: memref<1x16x256xf32, #tpu.memory_space<vmem>>, %arg5: memref<4x290xf32, #tpu.memory_space<vmem>>, %arg6: memref<36x256xf32, #tpu.memory_space<vmem>>) attributes {dimension_semantics = [#tpu.dimension_semantics<parallel>], iteration_bounds = array<i64: 2>, scalar_prefetch = 0 : i64, scratch_operands = 2 : i64, tpu.core_type = #tpu.core_type<tc>, window_params = [{transform_indices = @transform_0, window_bounds = array<i64: 1, 4, 256>}, {pipeline_mode = #tpu.pipeline_mode<synchronous>, transform_indices = @transform_1, window_bounds = array<i64: 16, 36>}, {pipeline_mode = #tpu.pipeline_mode<synchronous>, transform_indices = @transform_2, window_bounds = array<i64: 16, 1>}, {transform_indices = @transform_3, window_bounds = array<i64: 1, 16, 256>}]} {
    %cst = arith.constant 0.000000e+00 : f32
    %0 = vector.broadcast %cst : f32 to vector<4x290xf32>
    %c0 = arith.constant 0 : index
    %c0_0 = arith.constant 0 : index
    %1 = vector.load %arg5[%c0, %c0_0] : memref<4x290xf32, #tpu.memory_space<vmem>>, vector<4x290xf32>
    tpu.vector_store %arg5[%c0, %c0_0], %0 {strides = array<i32>} : memref<4x290xf32, #tpu.memory_space<vmem>>, vector<4x290xf32>,
    %c0_1 = arith.constant 0 : index
    %c0_2 = arith.constant 0 : index
    %c0_3 = arith.constant 0 : index
    %2 = vector.load %arg1[%c0_1, %c0_2, %c0_3] : memref<1x4x256xf32, #tpu.memory_space<vmem>>, vector<1x4x256xf32>
    %3 = vector.shape_cast %2 : vector<1x4x256xf32> to vector<4x256xf32>
    %c0_4 = arith.constant 0 : index
    %c17 = arith.constant 17 : index
    %4 = vector.load %arg5[%c0_4, %c17] : memref<4x290xf32, #tpu.memory_space<vmem>>, vector<4x256xf32>
    tpu.vector_store %arg5[%c0_4, %c17], %3 {strides = array<i32>} : memref<4x290xf32, #tpu.memory_space<vmem>>, vector<4x256xf32>,
    %c0_5 = arith.constant 0 : index
    %c0_6 = arith.constant 0 : index
    %5 = vector.load %arg5[%c0_5, %c0_6] : memref<4x290xf32, #tpu.memory_space<vmem>>, vector<4x290xf32>
    %6 = tpu.iota {dimensions = array<i32: 1>} : vector<4x290xi32>
    %c16_i32 = arith.constant 16 : i32
    %c0_i32 = arith.constant 0 : i32
    %7 = arith.cmpi eq, %c16_i32, %c0_i32 : i32
    %c1_i32 = arith.constant 1 : i32
    %8 = arith.select %7, %c1_i32, %c16_i32 : i32
    %9 = vector.broadcast %8 : i32 to vector<4x290xi32>
    %10 = arith.remsi %6, %9 : vector<4x290xi32>
    %c0_i32_7 = arith.constant 0 : i32
    %11 = vector.broadcast %c0_i32_7 : i32 to vector<4x290xi32>
    %12 = arith.cmpi ne, %10, %11 : vector<4x290xi32>
    %c0_i32_8 = arith.constant 0 : i32
    %13 = vector.broadcast %c0_i32_8 : i32 to vector<4x290xi32>
    %14 = arith.cmpi slt, %10, %13 : vector<4x290xi32>
    %c0_i32_9 = arith.constant 0 : i32
    %15 = arith.cmpi slt, %8, %c0_i32_9 : i32
    %16 = vector.broadcast %15 : i1 to vector<4x290xi1>
    %17 = vector.broadcast %16 : vector<4x290xi1> to vector<4x290xi1>
    %18 = arith.xori %14, %17 : vector<4x290xi1>
    %19 = arith.andi %18, %12 : vector<4x290xi1>
    %20 = vector.broadcast %8 : i32 to vector<4x290xi32>
    %21 = arith.addi %10, %20 : vector<4x290xi32>
    %22 = arith.select %19, %21, %10 : vector<4x290xi1>, vector<4x290xi32>
    %cst_10 = arith.constant 0.000000e+00 : f32
    %23 = vector.broadcast %cst_10 : f32 to vector<4x290xf32>
    %c0_i32_11 = arith.constant 0 : i32
    %24 = vector.broadcast %c0_i32_11 : i32 to vector<4x290xi32>
    %25 = arith.cmpi eq, %22, %24 : vector<4x290xi32>
    %26 = arith.select %25, %23, %5 : vector<4x290xi1>, vector<4x290xf32>
    %c1_i32_12 = arith.constant 1 : i32
    %27 = vector.broadcast %c1_i32_12 : i32 to vector<4x290xi32>
    %28 = arith.cmpi eq, %22, %27 : vector<4x290xi32>
    %29 = arith.select %28, %23, %5 : vector<4x290xi1>, vector<4x290xf32>
    %30 = vector.extract_strided_slice %26 {offsets = [0, 0], sizes = [4, 256], strides = [1, 1]} : vector<4x290xf32> to vector<4x256xf32>
    %c0_13 = arith.constant 0 : index
    %c0_14 = arith.constant 0 : index
    %31 = vector.load %arg6[%c0_13, %c0_14] : memref<36x256xf32, #tpu.memory_space<vmem>>, vector<4x256xf32>
    tpu.vector_store %arg6[%c0_13, %c0_14], %30 {strides = array<i32>} : memref<36x256xf32, #tpu.memory_space<vmem>>, vector<4x256xf32>,
    %32 = vector.extract_strided_slice %5 {offsets = [0, 1], sizes = [4, 256], strides = [1, 1]} : vector<4x290xf32> to vector<4x256xf32>
    %c4 = arith.constant 4 : index
    %c0_15 = arith.constant 0 : index
    %33 = vector.load %arg6[%c4, %c0_15] : memref<36x256xf32, #tpu.memory_space<vmem>>, vector<4x256xf32>
    tpu.vector_store %arg6[%c4, %c0_15], %32 {strides = array<i32>} : memref<36x256xf32, #tpu.memory_space<vmem>>, vector<4x256xf32>,
    %34 = vector.extract_strided_slice %29 {offsets = [0, 2], sizes = [4, 256], strides = [1, 1]} : vector<4x290xf32> to vector<4x256xf32>
    %c8 = arith.constant 8 : index
    %c0_16 = arith.constant 0 : index
    %35 = vector.load %arg6[%c8, %c0_16] : memref<36x256xf32, #tpu.memory_space<vmem>>, vector<4x256xf32>
    tpu.vector_store %arg6[%c8, %c0_16], %34 {strides = array<i32>} : memref<36x256xf32, #tpu.memory_space<vmem>>, vector<4x256xf32>,
    %36 = vector.extract_strided_slice %26 {offsets = [0, 16], sizes = [4, 256], strides = [1, 1]} : vector<4x290xf32> to vector<4x256xf32>
    %c12 = arith.constant 12 : index
    %c0_17 = arith.constant 0 : index
    %37 = vector.load %arg6[%c12, %c0_17] : memref<36x256xf32, #tpu.memory_space<vmem>>, vector<4x256xf32>
    tpu.vector_store %arg6[%c12, %c0_17], %36 {strides = array<i32>} : memref<36x256xf32, #tpu.memory_space<vmem>>, vector<4x256xf32>,
    %38 = vector.extract_strided_slice %5 {offsets = [0, 17], sizes = [4, 256], strides = [1, 1]} : vector<4x290xf32> to vector<4x256xf32>
    %c16 = arith.constant 16 : index
    %c0_18 = arith.constant 0 : index
    %39 = vector.load %arg6[%c16, %c0_18] : memref<36x256xf32, #tpu.memory_space<vmem>>, vector<4x256xf32>
    tpu.vector_store %arg6[%c16, %c0_18], %38 {strides = array<i32>} : memref<36x256xf32, #tpu.memory_space<vmem>>, vector<4x256xf32>,
    %40 = vector.extract_strided_slice %29 {offsets = [0, 18], sizes = [4, 256], strides = [1, 1]} : vector<4x290xf32> to vector<4x256xf32>
    %c20 = arith.constant 20 : index
    %c0_19 = arith.constant 0 : index
    %41 = vector.load %arg6[%c20, %c0_19] : memref<36x256xf32, #tpu.memory_space<vmem>>, vector<4x256xf32>
    tpu.vector_store %arg6[%c20, %c0_19], %40 {strides = array<i32>} : memref<36x256xf32, #tpu.memory_space<vmem>>, vector<4x256xf32>,
    %42 = vector.extract_strided_slice %26 {offsets = [0, 32], sizes = [4, 256], strides = [1, 1]} : vector<4x290xf32> to vector<4x256xf32>
    %c24 = arith.constant 24 : index
    %c0_20 = arith.constant 0 : index
    %43 = vector.load %arg6[%c24, %c0_20] : memref<36x256xf32, #tpu.memory_space<vmem>>, vector<4x256xf32>
    tpu.vector_store %arg6[%c24, %c0_20], %42 {strides = array<i32>} : memref<36x256xf32, #tpu.memory_space<vmem>>, vector<4x256xf32>,
    %44 = vector.extract_strided_slice %5 {offsets = [0, 33], sizes = [4, 256], strides = [1, 1]} : vector<4x290xf32> to vector<4x256xf32>
    %c28 = arith.constant 28 : index
    %c0_21 = arith.constant 0 : index
    %45 = vector.load %arg6[%c28, %c0_21] : memref<36x256xf32, #tpu.memory_space<vmem>>, vector<4x256xf32>
    tpu.vector_store %arg6[%c28, %c0_21], %44 {strides = array<i32>} : memref<36x256xf32, #tpu.memory_space<vmem>>, vector<4x256xf32>,
    %46 = vector.extract_strided_slice %29 {offsets = [0, 34], sizes = [4, 256], strides = [1, 1]} : vector<4x290xf32> to vector<4x256xf32>
    %c32 = arith.constant 32 : index
    %c0_22 = arith.constant 0 : index
    %47 = vector.load %arg6[%c32, %c0_22] : memref<36x256xf32, #tpu.memory_space<vmem>>, vector<4x256xf32>
    tpu.vector_store %arg6[%c32, %c0_22], %46 {strides = array<i32>} : memref<36x256xf32, #tpu.memory_space<vmem>>, vector<4x256xf32>,
    %c0_23 = arith.constant 0 : index
    %c0_24 = arith.constant 0 : index
    %48 = vector.load %arg2[%c0_23, %c0_24] : memref<16x36xbf16, #tpu.memory_space<vmem>>, vector<16x36xbf16>
    %c0_25 = arith.constant 0 : index
    %c0_26 = arith.constant 0 : index
    %49 = vector.load %arg6[%c0_25, %c0_26] : memref<36x256xf32, #tpu.memory_space<vmem>>, vector<36x256xf32>
    %50 = arith.truncf %49 : vector<36x256xf32> to vector<36x256xbf16>
    %cst_27 = arith.constant dense<0.000000e+00> : vector<16x256xf32>
    %51 = tpu.matmul %48, %50, %cst_27 {dimension_numbers = #tpu.dot_dimension_numbers<[1], [0], [0], [1], [0, 0, 1, 1], [], []>} : vector<16x36xbf16>, vector<36x256xbf16>, vector<16x256xf32> -> vector<16x256xf32>
    %c0_28 = arith.constant 0 : index
    %c0_29 = arith.constant 0 : index
    %52 = vector.load %arg3[%c0_28, %c0_29] : memref<16x1xf32, #tpu.memory_space<vmem>>, vector<16x1xf32>
    %53 = vector.broadcast %52 : vector<16x1xf32> to vector<16x256xf32>
    %54 = arith.addf %51, %53 : vector<16x256xf32>
    %c0_30 = arith.constant 0 : index
    %c0_31 = arith.constant 0 : index
    %c0_32 = arith.constant 0 : index
    %55 = vector.load %arg4[%c0_30, %c0_31, %c0_32] : memref<1x16x256xf32, #tpu.memory_space<vmem>>, vector<1x16x256xf32>
    %56 = vector.shape_cast %55 : vector<1x16x256xf32> to vector<16x256xf32>
    %57 = vector.shape_cast %54 : vector<16x256xf32> to vector<1x16x256xf32>
    tpu.vector_store %arg4[%c0_30, %c0_31, %c0_32], %57 {strides = array<i32>} : memref<1x16x256xf32, #tpu.memory_space<vmem>>, vector<1x16x256xf32>,
    return
  }
  func.func @transform_0(%arg0: i32) -> (i32, i32, i32) {
    %c0_i32 = arith.constant 0 : i32
    %c0_i32_0 = arith.constant 0 : i32
    %c0_i32_1 = arith.constant 0 : i32
    return %arg0, %c0_i32, %c0_i32_0 : i32, i32, i32
  }
  func.func @transform_1(%arg0: i32) -> (i32, i32) {
    %c0_i32 = arith.constant 0 : i32
    %c0_i32_0 = arith.constant 0 : i32
    %c0_i32_1 = arith.constant 0 : i32
    return %c0_i32, %c0_i32_0 : i32, i32
  }
  func.func @transform_2(%arg0: i32) -> (i32, i32) {
    %c0_i32 = arith.constant 0 : i32
    %c0_i32_0 = arith.constant 0 : i32
    %c0_i32_1 = arith.constant 0 : i32
    return %c0_i32, %c0_i32_0 : i32, i32
  }
  func.func @transform_3(%arg0: i32) -> (i32, i32, i32) {
    %c0_i32 = arith.constant 0 : i32
    %c0_i32_0 = arith.constant 0 : i32
    %c0_i32_1 = arith.constant 0 : i32
    return %arg0, %c0_i32, %c0_i32_0 : i32, i32, i32
  }
}

</mosaic_0001>

<bundles_post_ra>
// kernel: tpu_custom_call.1
= control target key start
LH: loop header
LB: loop body
LE: loop exit
PB: predicated region body
PF: predicated region fallthrough
CT: control target
= control target key end

     0   :  { %8 = vsyncpa [#allocation5], 0  ;;  %s928_s0 = inlined_call_operand.vmem [shape: f32[2,4,256], index: 0, kind: input, shape index: {}]   ;;  %s929_s1 = inlined_call_operand.hbm [shape: bf16[16,36], index: 1, kind: input, shape index: {}]   ;;  %s930_s2 = inlined_call_operand.vmem [shape: f32[16,1], index: 2, kind: input, shape index: {}]   ;;  %s931_s3 = inlined_call_operand.hbm [shape: f32[2,16,256], index: 3, kind: output, shape index: {}]  }
   0x1   :  { %9 = vsyncpa [#allocation6], 0 }
   0x2   :  { %11 = vsyncpa [#allocation6 + $0x1], 0  ;;  %s810_s12 = smov 0   ;;  %s812_s13 = smov 0  }
   0x3   :  { %s814_s14 = smov 0   ;;  %s816_s15 = smov 0  }
   0x4 LB: > { %s831_s16 = sadd.s32 4294967295, %s772_s15   ;;  %s585_s17 = sadd.s32 4294967294, %s772_s15   ;;  %s772_s15 = sphi %s816_s15, %s937_s15   ;;  %s768_s14 = sphi %s814_s14, %s936_s14   ;;  %s764_s13 = sphi %s812_s13, %s935_s13   ;;  %s760_s12 = sphi %s810_s12, %s934_s12  }
   0x5   : > { %s835_s18 = sadd.s32 1, %s772_s15   ;;  %s92_s19 = sadd.s32 1, %s768_s14 }
   0x6   : > { %s89_s20 = ssub.s32 %s772_s15, %s835_s18  ;;  %p102_p0 = scmp.ne.s32.totalorder %s768_s14, %s764_s13 }
   0x7   : > { %p90_p1 = scmp.eq.s32.totalorder %s89_s20, 0  ;;  %p103_p2 = scmp.eq.s32.totalorder %s831_s16, 1 }
   0x8   : > { %p108_p3 = scmp.ne.s32.totalorder %s764_s13, %s760_s12  ;;  %p109_p4 = scmp.eq.s32.totalorder %s585_s17, 1 }
   0x9   : > { %s846_s21 = scalar_select %p90_p1, %s768_s14, %s92_s19  }
   0xa   : > { %p848_p5 = por %p103_p2, %p102_p0  ;;  %p852_p6 = por %p109_p4, %p108_p3 }
   0xb   : > { %p586_p7 = scmp.ge.s32.totalorder %s772_s15, 1  ;;  %p116_p8 = scmp.lt.s32.totalorder %s772_s15, 3 }
   0xc   : > { %p622_p9 = scmp.eq.s32.totalorder %s831_s16, 0  ;;  %s127_s26 = sshll.u32 %s929_s1, 4  ;;  %s128_s26 = int_to_ptr.hbm [resolvable:$true] %s127_s26 }
   0xd   : > { %p117_p10 = pnand %p586_p7, %p116_p8  ;;  %s774_s27 = smov [#allocation4]  }
   0xe   : > { %s129_s28 = sshll.u32 %s774_s27, 4  ;;  %s775_s29 = smov 64   ;;  %s130_s28 = int_to_ptr.vmem [resolvable:$true] %s129_s28 }
   0xf   : > { %p614_p11 = pneg %p117_p10  ;;  %s776_s30 = smov 4  }
  0x10   : > { %156 = sbr.rel (%p117_p10) target bundleno = 490 (0x1ea), region = 32 }
  0x11   : > { %p615_p12 = pnand %p622_p9, %p614_p11 }
  0x13   : > { %617 = dma.hbm_to_vmem [thread:$0]  (!%p615_p12), %s128_s26, 128, %s130_s28, [#allocation5], %s775_s29, %s775_s29, %s776_s30  }
  0x15   : > { %751 = dma.done.wait (%p622_p9), [#allocation5], 128  }
  0x16   : > { %753 = vsyncadd (%p622_p9), [#allocation5], 4294967168  ;;  %p181_p13 = scmp.lt.s32.totalorder %s831_s16, 1  ;;  %vm188_vm0 = vcmask 273408   ;;  %v777_v0 = vmov 0.0   ;;  %s778_s9 = smov 17   ;;  %v207_v3 = vlaneseq }
  0x17   : > { %187 = vst [vmem:[#allocation2] sm:$0xff] %v777_v0  ;;  %vm199_vm1 = vcmask 1043592   ;;  %vm200_vm2 = vcmask 1047556   ;;  %vm195_vm3 = vcmask 138240   ;;  %vm203_vm4 = vcmask 134144   ;;  %s779_s10 = smov 96  }
  0x18   : > { %s182_s4 = scalar_select %p181_p13, %s831_s16, 1  ;;  %189 = vst.msk [vmem:[#allocation2 + $0x8] sm:$0xf] %vm188_vm0, %v777_v0  ;;  %vm201_vm5 = vmor %vm200_vm2, %vm199_vm1  ;;  %v208_v6 = vand.u32 127, %v207_v3  ;;  %vm377_vm12 = vcmask 785408   ;;  %vm310_vm13 = vcmask 1031168  }
  0x19   : > { %s780_s11 = smov 126   ;;  %s781_s17 = smov 94   ;;  %vm410_vm14 = vcmask 769024   ;;  %vm348_vm15 = vcmask 908288   ;;  %vm364_vm0 = vcmask 900096   ;;  %vm456_vm1 = vcmask 1041408  }
  0x1a   : > { %s605_s5 = sshll.u32 %s182_s4, 3  ;;  %v210_v7 = vadd.s32 256, %v208_v6  ;;  %v209_v8 = vadd.s32 128, %v208_v6  ;;  %v215_v13 = vand.u32 15, %v208_v6  ;;  %s782_s19 = smov 110   ;;  %vm294_vm2 = vcmask 1039360  }
  0x1b   : > { %s185_s8 = scalar_lea.vmem %s928_s0, %s605_s5  ;;  %s783_s20 = smov 127  }
  0x1c   : > { %v190_v1 = vld [vmem:[%s185_s8] sm:$0xff]  ;;  %v229_v11 = vand.u32 15, %v210_v7  ;;  %v222_v12 = vand.u32 15, %v209_v8  ;;  %vm247_vm8 = vcmp.eq.s32.totalorder %v215_v13, 0  ;;  %vm264_vm11 = vcmp.eq.s32.totalorder %v215_v13, 1  ;;  %s784_s24 = smov 111  }
  0x1d   : > { %192 = vrot.lane.b32.xlu0 %v190_v1, %s778_s9  ;;  %s785_s25 = smov 95   ;;  %s786_s26 = smov 112  }
  0x1e   : > { %vm249_vm6 = vcmp.eq.s32.totalorder %v229_v11, 0  ;;  %vm248_vm7 = vcmp.eq.s32.totalorder %v222_v12, 0  ;;  %vm266_vm9 = vcmp.eq.s32.totalorder %v229_v11, 1  ;;  %vm265_vm10 = vcmp.eq.s32.totalorder %v222_v12, 1  ;;  %v435_v11 = vld [vmem:[%s930_s2] sm:$0xff]  ;;  %v436_v12 = vld [vmem:[%s930_s2 + $0x8] sm:$0xff] }
  0x1f   : > { %s178_s4 = sand.u32 1, %s764_s13   ;;  %s607_s6 = sshll.u32 %s831_s16, 5 }
  0x20   : > { %s591_s5 = sshll.u32 %s178_s4, 5  ;;  %s496_s16 = scalar_lea.sflag [#allocation6], %s178_s4 }
  0x21   : > { %s180_s7 = scalar_lea.vmem [#allocation7], %s591_s5 }
  0x8f   : > { %v193_v2 = vpop.permute.xlu0 %192 }
  0x90   : > { %v194_v4 = vrot.slane %v193_v2, 4 }
  0x92   : > { %v196_v5 = vsel %vm195_vm3, %v194_v4, %v193_v2  ;;  %204 = vst.msk [vmem:[#allocation2 + $0x8] sm:$0xf] %vm203_vm4, %v194_v4  ;;  %vm397_vm3 = vcmask 777216   ;;  %vm329_vm4 = vcmask 916480  }
  0x93   : > { %202 = vst.msk [vmem:[#allocation2] sm:$0xff] %vm201_vm5, %v196_v5  ;;  %vm452_vm5 = vcmask 293888  }
  0x99   : > { %v206_v9 = vld [vmem:[#allocation2 + $0x8] sm:$0xf] }
  0x9a   : > { %v205_v10 = vld [vmem:[#allocation2] sm:$0xff]  ;;  %254 = vst [vmem:[#allocation1 + $0x10] ss:$2 sm:$0xff] %v206_v9 }
  0x9b   : > { %252 = vst [vmem:[#allocation1] ss:$2 sm:$0xff] %v205_v10 }
  0xa1   : > { %v257_v14 = vld.sshfl [vmem:[#allocation1 + $0x10] sm:$0xff pattern:$0x75316420] }
  0xa2   : > { %v873_v15 = vsel %vm249_vm6, 0.0, %v257_v14  ;;  %269 = vst [vmem:[#allocation1 + $0x10] ss:$2 sm:$0xff] %v206_v9  ;;  %v256_v16 = vld.sshfl [vmem:[#allocation1 + $0x8] sm:$0xff pattern:$0x75316420] }
  0xa3   : > { %375 = vrot.lane.b32.xlu0 %v873_v15, %s779_s10  ;;  %v876_v17 = vsel %vm248_vm7, 0.0, %v256_v16  ;;  %v255_v18 = vld.sshfl [vmem:[#allocation1] sm:$0xff pattern:$0x75316420]  ;;  %v322_v38 = vrot.slane %v873_v15, 4  ;;  %v787_v14 = vmov 0  }
  0xa4   : > { %373 = vrot.lane.b32.xlu2 %v876_v17, %s779_s10  ;;  %280 = vst [vmem:[#allocation3] sm:$0xf] %v876_v17  ;;  %v261_v19 = vsel %vm247_vm8, 0.0, %v255_v18  ;;  %v321_v40 = vrot.slane %v876_v17, 4  ;;  %673 = vset.pattern.permute.xlu1 %v787_v14 }
  0xa5   : > { %267 = vst [vmem:[#allocation1] ss:$2 sm:$0xff] %v205_v10  ;;  %371 = vrot.lane.b32.xlu1 %v261_v19, %s779_s10  ;;  %v320_v39 = vrot.slane %v261_v19, 4  ;;  %674 = vset.pattern.permute.xlu2 %v787_v14  ;;  %s507_s10 = scalar_lea.hbm %s931_s3, %s607_s6 }
  0xa6   : > { %279 = vst [vmem:[#allocation3 + $0x30] sm:$0xf] %v261_v19  ;;  %675 = vset.pattern.permute.xlu0 %v787_v14 }
  0xa9   : > { %v272_v20 = vld.sshfl [vmem:[#allocation1 + $0x10] sm:$0xff pattern:$0x75316420] }
  0xaa   : > { %v278_v21 = vsel %vm266_vm9, 0.0, %v272_v20  ;;  %284 = vst [vmem:[#allocation1 + $0x11] ss:$2 sm:$0xff] %v206_v9 }
  0xab   : > { %308 = vrot.lane.b32.xlu0 %v278_v21, %s780_s11  ;;  %v357_v30 = vrot.slane %v278_v21, 4 }
  0xac   : > { %v271_v22 = vld.sshfl [vmem:[#allocation1 + $0x8] sm:$0xff pattern:$0x75316420]  ;;  %v270_v23 = vld.sshfl [vmem:[#allocation1] sm:$0xff pattern:$0x75316420] }
  0xad   : > { %v277_v24 = vsel %vm265_vm10, 0.0, %v271_v22  ;;  %408 = vrot.lane.b32.xlu1 %v278_v21, %s781_s17  ;;  %282 = vst [vmem:[#allocation1 + $0x1] ss:$2 sm:$0xff] %v205_v10  ;;  %v276_v26 = vsel %vm264_vm11, 0.0, %v270_v23 }
  0xae   : > { %306 = vrot.lane.b32.xlu2 %v277_v24, %s780_s11  ;;  %v356_v27 = vrot.slane %v277_v24, 4  ;;  %v355_v34 = vrot.slane %v276_v26, 4 }
  0xb1   : > { %v287_v25 = vld.sshfl [vmem:[#allocation1 + $0x10] sm:$0xff pattern:$0x75316420] }
  0xb2   : > { %338 = vst [vmem:[#allocation1 + $0x10] ss:$2 sm:$0xff] %v206_v9 }
  0xb3   : > { %404 = vrot.lane.b32.xlu0 %v276_v26, %s781_s17 }
  0xb4   : > { %v286_v28 = vld.sshfl [vmem:[#allocation1 + $0x8] sm:$0xff pattern:$0x75316420]  ;;  %v285_v29 = vld.sshfl [vmem:[#allocation1] sm:$0xff pattern:$0x75316420] }
  0xb5   : > { %406 = vrot.lane.b32.xlu1 %v277_v24, %s781_s17  ;;  %336 = vst [vmem:[#allocation1] ss:$2 sm:$0xff] %v205_v10  ;;  %s510_s17 = sshll.u32 %s507_s10, 4  ;;  %s511_s17 = int_to_ptr.hbm [resolvable:$true] %s510_s17 }
  0xb6   : > { %360 = vrot.lane.b32.xlu2 %v356_v27, %s782_s19 }
  0xb9   : > { %v341_v31 = vld.sshfl [vmem:[#allocation1 + $0x10] sm:$0xff pattern:$0x75316420] }
  0xba   : > { %387 = vst [vmem:[#allocation1 + $0x11] ss:$2 sm:$0xff] %v206_v9 }
  0xbb   : > { %362 = vrot.lane.b32.xlu0 %v357_v30, %s782_s19 }
  0xbc   : > { %v339_v32 = vld.sshfl [vmem:[#allocation1] sm:$0xff pattern:$0x75316420]  ;;  %v340_v33 = vld.sshfl [vmem:[#allocation1 + $0x8] sm:$0xff pattern:$0x75316420] }
  0xbd   : > { %304 = vrot.lane.b32.xlu1 %v276_v26, %s780_s11  ;;  %385 = vst [vmem:[#allocation1 + $0x1] ss:$2 sm:$0xff] %v205_v10  ;;  %s508_s11 = sshll.u32 %s180_s7, 4  ;;  %s509_s11 = int_to_ptr.vmem [resolvable:$true] %s508_s11 }
  0xbe   : > { %290 = vrot.lane.b32.xlu2 %v286_v28, %s783_s20 }
  0xc1   : > { %v390_v35 = vld.sshfl [vmem:[#allocation1 + $0x10] sm:$0xff pattern:$0x75316420] }
  0xc3   : > { %292 = vrot.lane.b32.xlu0 %v287_v25, %s783_s20 }
  0xc4   : > { %v388_v36 = vld.sshfl [vmem:[#allocation1] sm:$0xff pattern:$0x75316420]  ;;  %v389_v37 = vld.sshfl [vmem:[#allocation1 + $0x8] sm:$0xff pattern:$0x75316420] }
  0xc5   : > { %358 = vrot.lane.b32.xlu1 %v355_v34, %s782_s19  ;;  %s720_s19 = sshra.s32 %s511_s17, 4  ;;  %s721_s19 = int_to_ptr.hbm [resolvable:$true] %s720_s19 }
  0xc6   : > { %342 = vrot.lane.b32.xlu2 %v339_v32, %s784_s24  ;;  %p727_p3 = scmp.lt.s32.totalorder %s721_s19, %s931_s3 }
  0xcb   : > { %346 = vrot.lane.b32.xlu0 %v341_v31, %s784_s24 }
  0xcd   : > { %288 = vrot.lane.b32.xlu1 %v285_v29, %s783_s20  ;;  %s722_s20 = scalar_lea.hbm %s721_s19, 32 }
  0xce   : > { %344 = vrot.lane.b32.xlu2 %v340_v33, %s784_s24  ;;  %p723_p0 = scmp.ne.s32.totalorder %s721_s19, %s722_s20 }
  0xd0   : > { %p724_p1 = pnand %p723_p0, %p848_p5 }
  0xd2   : > { %p725_p2 = pneg %p724_p1 }
  0xd3   : > { %395 = vrot.lane.b32.xlu0 %v390_v35, %s785_s25 }
  0xd5   : > { %391 = vrot.lane.b32.xlu1 %v388_v36, %s785_s25 }
  0xd6   : > { %393 = vrot.lane.b32.xlu2 %v389_v37, %s785_s25  ;;  %v606_v37 = vld [vmem:[#allocation4] sm:$0xff] }
  0xdb   : > { %327 = vrot.lane.b32.xlu0 %v322_v38, %s786_s26 }
  0xdd   : > { %323 = vrot.lane.b32.xlu1 %v320_v39, %s786_s26 }
  0xde   : > { %325 = vrot.lane.b32.xlu2 %v321_v40, %s786_s26  ;;  %s726_s26 = scalar_lea.hbm %s931_s3, 64 }
  0xdf   : > { %p728_p4 = scmp.lt.s32.totalorder %s726_s26, %s722_s20 }
  0xe1   : > { %p729_p7 = por %p728_p4, %p727_p3 }
  0xe3   : > { %p730_p8 = pnand %p729_p7, %p725_p2 }
  0xe5   : > { %439 = vperm.xlu1 %673, %v435_v11  }
  0xe6   : > { %444 = vperm.xlu2 %674, %v436_v12  }
  0xfe   : > { %v374_v41 = vpop.permute.xlu2 %373 }
 0x108   : > { %v307_v42 = vpop.permute.xlu2 %306 }
 0x110   : > { %v361_v43 = vpop.permute.xlu2 %360 }
 0x115   : > { %v376_v44 = vpop.permute.xlu0 %375 }
 0x116   : > { %v379_v45 = vsel %vm377_vm12, %v374_v41, %v376_v44 }
 0x117   : > { %383 = vst [vmem:[#allocation3 + $0x20] sm:$0xf] %v379_v45  ;;  %v372_v46 = vpop.permute.xlu1 %371 }
 0x118   : > { %v291_v47 = vpop.permute.xlu2 %290  ;;  %v378_v48 = vsel %vm377_vm12, %v372_v46, %v374_v41 }
 0x119   : > { %382 = vst [vmem:[#allocation3 + $0x8] sm:$0xf] %v378_v48 }
 0x11d   : > { %v309_v49 = vpop.permute.xlu0 %308 }
 0x11e   : > { %v312_v50 = vsel %vm310_vm13, %v307_v42, %v309_v49 }
 0x11f   : > { %316 = vst [vmem:[#allocation3 + $0x10] sm:$0xf] %v312_v50  ;;  %v409_v51 = vpop.permute.xlu1 %408 }
 0x120   : > { %v343_v52 = vpop.permute.xlu2 %342 }
 0x125   : > { %v405_v53 = vpop.permute.xlu0 %404 }
 0x127   : > { %v407_v54 = vpop.permute.xlu1 %406 }
 0x128   : > { %v345_v55 = vpop.permute.xlu2 %344  ;;  %v411_v56 = vsel %vm410_vm14, %v405_v53, %v407_v54  ;;  %v412_v57 = vsel %vm410_vm14, %v407_v54, %v409_v51 }
 0x129   : > { %v349_v58 = vsel %vm348_vm15, %v343_v52, %v345_v55  ;;  %415 = vst [vmem:[#allocation3 + $0x40] sm:$0xf] %v411_v56 }
 0x12a   : > { %353 = vst [vmem:[#allocation3 + $0x48] sm:$0xf] %v349_v58 }
 0x12b   : > { %416 = vst [vmem:[#allocation3 + $0x38] sm:$0xf] %v412_v57 }
 0x12d   : > { %v363_v59 = vpop.permute.xlu0 %362 }
 0x12e   : > { %v366_v60 = vsel %vm364_vm0, %v361_v43, %v363_v59 }
 0x12f   : > { %370 = vst [vmem:[#allocation3 + $0x28] sm:$0xf0] %v366_v60  ;;  %v305_v61 = vpop.permute.xlu1 %304 }
 0x130   : > { %v311_v62 = vsel %vm310_vm13, %v305_v61, %v307_v42  ;;  %v427_v63 = vld [vmem:[#allocation3 + $0x40] sm:$0xf]  ;;  %v394_v16 = vpop.permute.xlu2 %393 }
 0x131   : > { %315 = vst [vmem:[#allocation3 + $0x18] sm:$0xf] %v311_v62  ;;  %v433_v0 = vpack.c.bf16 %v427_v63, %v427_v63 }
 0x132   : > { %v428_v1 = vld [vmem:[#allocation3 + $0x38] sm:$0xf] }
 0x133   : > { %v458_v2 = vsel %vm456_vm1, %v433_v0, 0  ;;  %v434_v3 = vpack.c.bf16 %v428_v1, %v428_v1 }
 0x134   : > { %468 = vmatpush.bf16.msra.mxu0 %v458_v2 }
 0x135   : > { %v461_v4 = vsel %vm456_vm1, %v434_v3, 0  ;;  %v293_v5 = vpop.permute.xlu0 %292 }
 0x136   : > { %482 = vmatpush.bf16.msra.mxu1 %v461_v4  ;;  %v296_v6 = vsel %vm294_vm2, %v291_v47, %v293_v5 }
 0x137   : > { %300 = vst [vmem:[#allocation3] sm:$0xf0] %v296_v6  ;;  %v359_v7 = vpop.permute.xlu1 %358 }
 0x138   : > { %v365_v8 = vsel %vm364_vm0, %v359_v7, %v361_v43  ;;  %v326_v21 = vpop.permute.xlu2 %325 }
 0x139   : > { %369 = vst [vmem:[#allocation3 + $0x48] sm:$0xf0] %v365_v8 }
 0x13d   : > { %v347_v9 = vpop.permute.xlu0 %346 }
 0x13e   : > { %v350_v10 = vsel %vm348_vm15, %v345_v55, %v347_v9  ;;  %v420_v32 = vld [vmem:[#allocation3] sm:$0xff] }
 0x13f   : > { %354 = vst [vmem:[#allocation3 + $0x28] sm:$0xf] %v350_v10  ;;  %v289_v13 = vpop.permute.xlu1 %288 }
 0x140   : > { %v295_v15 = vsel %vm294_vm2, %v289_v13, %v291_v47  ;;  %v423_v29 = vld [vmem:[#allocation3 + $0x48] sm:$0xff]  ;;  %v445_v44 = vpop.permute.xlu2 %444 }
 0x141   : > { %299 = vst [vmem:[#allocation3 + $0x30] sm:$0xf0] %v295_v15 }
 0x145   : > { %v396_v17 = vpop.permute.xlu0 %395 }
 0x146   : > { %v399_v18 = vsel %vm397_vm3, %v394_v16, %v396_v17  ;;  %v424_v24 = vld [vmem:[#allocation3 + $0x28] sm:$0xff] }
 0x147   : > { %403 = vst [vmem:[#allocation3 + $0x20] sm:$0xf0] %v399_v18  ;;  %v392_v19 = vpop.permute.xlu1 %391 }
 0x148   : > { %v398_v20 = vsel %vm397_vm3, %v392_v19, %v394_v16  ;;  %v419_v35 = vld [vmem:[#allocation3 + $0x30] sm:$0xff] }
 0x149   : > { %402 = vst [vmem:[#allocation3 + $0x8] sm:$0xf0] %v398_v20 }
 0x14d   : > { %v328_v22 = vpop.permute.xlu0 %327 }
 0x14e   : > { %v331_v23 = vsel %vm329_vm4, %v326_v21, %v328_v22  ;;  %v426_v25 = vld [vmem:[#allocation3 + $0x20] sm:$0xff] }
 0x14f   : > { %335 = vst [vmem:[#allocation3 + $0x10] sm:$0xf0] %v331_v23  ;;  %v324_v26 = vpop.permute.xlu1 %323  ;;  %v432_v27 = vpack.c.bf16 %v426_v25, %v424_v24 }
 0x150   : > { %v330_v28 = vsel %vm329_vm4, %v324_v26, %v326_v21  ;;  %v425_v30 = vld [vmem:[#allocation3 + $0x8] sm:$0xff] }
 0x151   : > { %334 = vst [vmem:[#allocation3 + $0x18] sm:$0xf0] %v330_v28  ;;  %483 = vmatpush.bf16.msra.mxu1 %v432_v27  ;;  %v431_v31 = vpack.c.bf16 %v425_v30, %v423_v29 }
 0x153   : > { %469 = vmatpush.bf16.msra.mxu0 %v431_v31 }
 0x156   : > { %v422_v33 = vld [vmem:[#allocation3 + $0x10] sm:$0xff] }
 0x157   : > { %v430_v34 = vpack.c.bf16 %v422_v33, %v420_v32  ;;  %v440_v39 = vpop.permute.xlu1 %439 }
 0x158   : > { %v421_v36 = vld [vmem:[#allocation3 + $0x18] sm:$0xff] }
 0x159   : > { %484 = vmatpush.bf16.msra.mxu1 %v430_v34  ;;  %v429_v38 = vpack.c.bf16 %v421_v36, %v419_v35 }
 0x15b   : > { %470 = vmatpush.bf16.msra.mxu0 %v429_v38 }
 0x15c   : > { %599 = vmatmul.msk.bf16.vlgmr.msra.gmra.mxu1 %vm452_vm5, %v606_v37 }
 0x15e   : > { %598 = vmatmul.msk.bf16.vlgmr.msra.gmra.mxu0 %vm452_vm5, %v606_v37 }
 0x1d9   : > { %v486_v40 = vpop.f32.mrf.mxu1 }
 0x1da   : > { %v487_v41 = vadd.f32 %v486_v40, %v440_v39 }
 0x1db   : > { %v472_v42 = vpop.f32.mrf.mxu0 }
 0x1dc   : > { %492 = vst [vmem:[%s180_s7 + $0x8] sm:$0xff] %v487_v41  ;;  %v473_v43 = vadd.f32 %v472_v42, %v440_v39 }
 0x1de   : > { %491 = vst [vmem:[%s180_s7] sm:$0xff] %v473_v43 }
 0x1e1   : > { %v488_v45 = vpop.f32.mrf.mxu1 }
 0x1e2   : > { %v489_v46 = vadd.f32 %v488_v45, %v445_v44 }
 0x1e3   : > { %v474_v47 = vpop.f32.mrf.mxu0 }
 0x1e4   : > { %494 = vst [vmem:[%s180_s7 + $0x18] sm:$0xff] %v489_v46  ;;  %v475_v48 = vadd.f32 %v474_v47, %v445_v44 }
 0x1e6   : > { %493 = vst [vmem:[%s180_s7 + $0x10] sm:$0xff] %v475_v48 }
 0x1e7   : > { %733 = shalt.err (!%p730_p8)
}
 0x1e8   : > { %s788_s29 = smov 256   ;;  %s789_s30 = smov 16  }
 0x1e9   : > { %612 = dma.vmem_to_hbm [thread:$0]  (%p848_p5), %s509_s11, 512, %s511_s17, %s496_s16, %s788_s29, %s788_s29, %s789_s30  }
 0x1ea PF: > { %p624_p9 = scmp.ge.s32.totalorder %s772_s15, 2  ;;  %s525_s4 = sand.u32 1, %s760_s12  }
 0x1eb   : > { %s526_s5 = scalar_lea.sflag [#allocation6], %s525_s4 }
 0x1ec   : > { %p619_p10 = pnand %p624_p9, %p852_p6 }
 0x1ee   : > { %p620_p11 = pneg %p619_p10 }
 0x1f0   : > { %755 = dma.done.wait (%p620_p11), %s526_s5, 512  }
 0x1f1   : > { %757 = vsyncadd (%p620_p11), %s526_s5, 4294966784  ;;  %p14_p12 = scmp.ge.s32.totalorder %s835_s18, 4   ;;  %s934_s12 = smov %s764_s13 }
 0x1f2   : > { %s935_s13 = smov %s768_s14  ;;  %s936_s14 = smov %s846_s21 }
 0x1f3   : > { %s937_s15 = smov %s835_s18  ;;  %16 = sbr.rel (!%p14_p12) target bundleno = 4 (0x4), region = 79 }
 0x1f8   :  { %532 = vsyncpa [#allocation5], 1 }
 0x1f9   :  { %534 = vsyncpa [#allocation5 + $0x1], 1 }
 0x1fa   :  { %535 = vsyncpa [#allocation6], 1 }
 0x1fb   :  { %537 = vsyncpa [#allocation6 + $0x1], 1 }

// kernel: tpu_custom_call.1
= control target key start
LH: loop header
LB: loop body
LE: loop exit
PB: predicated region body
PF: predicated region fallthrough
CT: control target
= control target key end

     0   :  { %8 = vsyncpa [#allocation5], 0  ;;  %s928_s0 = inlined_call_operand.vmem [shape: f32[2,4,256], index: 0, kind: input, shape index: {}]   ;;  %s929_s1 = inlined_call_operand.hbm [shape: bf16[16,36], index: 1, kind: input, shape index: {}]   ;;  %s930_s2 = inlined_call_operand.vmem [shape: f32[16,1], index: 2, kind: input, shape index: {}]   ;;  %s931_s3 = inlined_call_operand.hbm [shape: f32[2,16,256], index: 3, kind: output, shape index: {}]  }
   0x1   :  { %9 = vsyncpa [#allocation6], 0 }
   0x2   :  { %11 = vsyncpa [#allocation6 + $0x1], 0  ;;  %s810_s12 = smov 0   ;;  %s812_s13 = smov 0  }
   0x3   :  { %s814_s14 = smov 0   ;;  %s816_s15 = smov 0  }
   0x4 LB: > { %s831_s16 = sadd.s32 4294967295, %s772_s15   ;;  %s585_s17 = sadd.s32 4294967294, %s772_s15   ;;  %s772_s15 = sphi %s816_s15, %s937_s15   ;;  %s768_s14 = sphi %s814_s14, %s936_s14   ;;  %s764_s13 = sphi %s812_s13, %s935_s13   ;;  %s760_s12 = sphi %s810_s12, %s934_s12  }
   0x5   : > { %s835_s18 = sadd.s32 1, %s772_s15   ;;  %s92_s19 = sadd.s32 1, %s768_s14 }
   0x6   : > { %s89_s20 = ssub.s32 %s772_s15, %s835_s18  ;;  %p102_p0 = scmp.ne.s32.totalorder %s768_s14, %s764_s13 }
   0x7   : > { %p90_p1 = scmp.eq.s32.totalorder %s89_s20, 0  ;;  %p103_p2 = scmp.eq.s32.totalorder %s831_s16, 1 }
   0x8   : > { %p108_p3 = scmp.ne.s32.totalorder %s764_s13, %s760_s12  ;;  %p109_p4 = scmp.eq.s32.totalorder %s585_s17, 1 }
   0x9   : > { %s846_s21 = scalar_select %p90_p1, %s768_s14, %s92_s19  }
   0xa   : > { %p848_p5 = por %p103_p2, %p102_p0  ;;  %p852_p6 = por %p109_p4, %p108_p3 }
   0xb   : > { %p586_p7 = scmp.ge.s32.totalorder %s772_s15, 1  ;;  %p116_p8 = scmp.lt.s32.totalorder %s772_s15, 3 }
   0xc   : > { %p622_p9 = scmp.eq.s32.totalorder %s831_s16, 0  ;;  %s127_s26 = sshll.u32 %s929_s1, 4  ;;  %s128_s26 = int_to_ptr.hbm [resolvable:$true] %s127_s26 }
   0xd   : > { %p117_p10 = pnand %p586_p7, %p116_p8  ;;  %s774_s27 = smov [#allocation4]  }
   0xe   : > { %s129_s28 = sshll.u32 %s774_s27, 4  ;;  %s775_s29 = smov 64   ;;  %s130_s28 = int_to_ptr.vmem [resolvable:$true] %s129_s28 }
   0xf   : > { %p614_p11 = pneg %p117_p10  ;;  %s776_s30 = smov 4  }
  0x10   : > { %156 = sbr.rel (%p117_p10) target bundleno = 490 (0x1ea), region = 32 }
  0x11   : > { %p615_p12 = pnand %p622_p9, %p614_p11 }
  0x13   : > { %617 = dma.hbm_to_vmem [thread:$0]  (!%p615_p12), %s128_s26, 128, %s130_s28, [#allocation5], %s775_s29, %s775_s29, %s776_s30  }
  0x15   : > { %751 = dma.done.wait (%p622_p9), [#allocation5], 128  }
  0x16   : > { %753 = vsyncadd (%p622_p9), [#allocation5], 4294967168  ;;  %p181_p13 = scmp.lt.s32.totalorder %s831_s16, 1  ;;  %vm188_vm0 = vcmask 273408   ;;  %v777_v0 = vmov 0.0   ;;  %s778_s9 = smov 17   ;;  %v207_v3 = vlaneseq }
  0x17   : > { %187 = vst [vmem:[#allocation2] sm:$0xff] %v777_v0  ;;  %vm199_vm1 = vcmask 1043592   ;;  %vm200_vm2 = vcmask 1047556   ;;  %vm195_vm3 = vcmask 138240   ;;  %vm203_vm4 = vcmask 134144   ;;  %s779_s10 = smov 96  }
  0x18   : > { %s182_s4 = scalar_select %p181_p13, %s831_s16, 1  ;;  %189 = vst.msk [vmem:[#allocation2 + $0x8] sm:$0xf] %vm188_vm0, %v777_v0  ;;  %vm201_vm5 = vmor %vm200_vm2, %vm199_vm1  ;;  %v208_v6 = vand.u32 127, %v207_v3  ;;  %vm377_vm12 = vcmask 785408   ;;  %vm310_vm13 = vcmask 1031168  }
  0x19   : > { %s780_s11 = smov 126   ;;  %s781_s17 = smov 94   ;;  %vm410_vm14 = vcmask 769024   ;;  %vm348_vm15 = vcmask 908288   ;;  %vm364_vm0 = vcmask 900096   ;;  %vm456_vm1 = vcmask 1041408  }
  0x1a   : > { %s605_s5 = sshll.u32 %s182_s4, 3  ;;  %v210_v7 = vadd.s32 256, %v208_v6  ;;  %v209_v8 = vadd.s32 128, %v208_v6  ;;  %v215_v13 = vand.u32 15, %v208_v6  ;;  %s782_s19 = smov 110   ;;  %vm294_vm2 = vcmask 1039360  }
  0x1b   : > { %s185_s8 = scalar_lea.vmem %s928_s0, %s605_s5  ;;  %s783_s20 = smov 127  }
  0x1c   : > { %v190_v1 = vld [vmem:[%s185_s8] sm:$0xff]  ;;  %v229_v11 = vand.u32 15, %v210_v7  ;;  %v222_v12 = vand.u32 15, %v209_v8  ;;  %vm247_vm8 = vcmp.eq.s32.totalorder %v215_v13, 0  ;;  %vm264_vm11 = vcmp.eq.s32.totalorder %v215_v13, 1  ;;  %s784_s24 = smov 111  }
  0x1d   : > { %192 = vrot.lane.b32.xlu0 %v190_v1, %s778_s9  ;;  %s785_s25 = smov 95   ;;  %s786_s26 = smov 112  }
  0x1e   : > { %vm249_vm6 = vcmp.eq.s32.totalorder %v229_v11, 0  ;;  %vm248_vm7 = vcmp.eq.s32.totalorder %v222_v12, 0  ;;  %vm266_vm9 = vcmp.eq.s32.totalorder %v229_v11, 1  ;;  %vm265_vm10 = vcmp.eq.s32.totalorder %v222_v12, 1  ;;  %v435_v11 = vld [vmem:[%s930_s2] sm:$0xff]  ;;  %v436_v12 = vld [vmem:[%s930_s2 + $0x8] sm:$0xff] }
  0x1f   : > { %s178_s4 = sand.u32 1, %s764_s13   ;;  %s607_s6 = sshll.u32 %s831_s16, 5 }
  0x20   : > { %s591_s5 = sshll.u32 %s178_s4, 5  ;;  %s496_s16 = scalar_lea.sflag [#allocation6], %s178_s4 }
  0x21   : > { %s180_s7 = scalar_lea.vmem [#allocation7], %s591_s5 }
  0x8f   : > { %v193_v2 = vpop.permute.xlu0 %192 }
  0x90   : > { %v194_v4 = vrot.slane %v193_v2, 4 }
  0x92   : > { %v196_v5 = vsel %vm195_vm3, %v194_v4, %v193_v2  ;;  %204 = vst.msk [vmem:[#allocation2 + $0x8] sm:$0xf] %vm203_vm4, %v194_v4  ;;  %vm397_vm3 = vcmask 777216   ;;  %vm329_vm4 = vcmask 916480  }
  0x93   : > { %202 = vst.msk [vmem:[#allocation2] sm:$0xff] %vm201_vm5, %v196_v5  ;;  %vm452_vm5 = vcmask 293888  }
  0x99   : > { %v206_v9 = vld [vmem:[#allocation2 + $0x8] sm:$0xf] }
  0x9a   : > { %v205_v10 = vld [vmem:[#allocation2] sm:$0xff]  ;;  %254 = vst [vmem:[#allocation1 + $0x10] ss:$2 sm:$0xff] %v206_v9 }
  0x9b   : > { %252 = vst [vmem:[#allocation1] ss:$2 sm:$0xff] %v205_v10 }
  0xa1   : > { %v257_v14 = vld.sshfl [vmem:[#allocation1 + $0x10] sm:$0xff pattern:$0x75316420] }
  0xa2   : > { %v873_v15 = vsel %vm249_vm6, 0.0, %v257_v14  ;;  %269 = vst [vmem:[#allocation1 + $0x10] ss:$2 sm:$0xff] %v206_v9  ;;  %v256_v16 = vld.sshfl [vmem:[#allocation1 + $0x8] sm:$0xff pattern:$0x75316420] }
  0xa3   : > { %375 = vrot.lane.b32.xlu0 %v873_v15, %s779_s10  ;;  %v876_v17 = vsel %vm248_vm7, 0.0, %v256_v16  ;;  %v255_v18 = vld.sshfl [vmem:[#allocation1] sm:$0xff pattern:$0x75316420]  ;;  %v322_v38 = vrot.slane %v873_v15, 4  ;;  %v787_v14 = vmov 0  }
  0xa4   : > { %373 = vrot.lane.b32.xlu2 %v876_v17, %s779_s10  ;;  %280 = vst [vmem:[#allocation3] sm:$0xf] %v876_v17  ;;  %v261_v19 = vsel %vm247_vm8, 0.0, %v255_v18  ;;  %v321_v40 = vrot.slane %v876_v17, 4  ;;  %673 = vset.pattern.permute.xlu1 %v787_v14 }
  0xa5   : > { %267 = vst [vmem:[#allocation1] ss:$2 sm:$0xff] %v205_v10  ;;  %371 = vrot.lane.b32.xlu1 %v261_v19, %s779_s10  ;;  %v320_v39 = vrot.slane %v261_v19, 4  ;;  %674 = vset.pattern.permute.xlu2 %v787_v14  ;;  %s507_s10 = scalar_lea.hbm %s931_s3, %s607_s6 }
  0xa6   : > { %279 = vst [vmem:[#allocation3 + $0x30] sm:$0xf] %v261_v19  ;;  %675 = vset.pattern.permute.xlu0 %v787_v14 }
  0xa9   : > { %v272_v20 = vld.sshfl [vmem:[#allocation1 + $0x10] sm:$0xff pattern:$0x75316420] }
  0xaa   : > { %v278_v21 = vsel %vm266_vm9, 0.0, %v272_v20  ;;  %284 = vst [vmem:[#allocation1 + $0x11] ss:$2 sm:$0xff] %v206_v9 }
  0xab   : > { %308 = vrot.lane.b32.xlu0 %v278_v21, %s780_s11  ;;  %v357_v30 = vrot.slane %v278_v21, 4 }
  0xac   : > { %v271_v22 = vld.sshfl [vmem:[#allocation1 + $0x8] sm:$0xff pattern:$0x75316420]  ;;  %v270_v23 = vld.sshfl [vmem:[#allocation1] sm:$0xff pattern:$0x75316420] }
  0xad   : > { %v277_v24 = vsel %vm265_vm10, 0.0, %v271_v22  ;;  %408 = vrot.lane.b32.xlu1 %v278_v21, %s781_s17  ;;  %282 = vst [vmem:[#allocation1 + $0x1] ss:$2 sm:$0xff] %v205_v10  ;;  %v276_v26 = vsel %vm264_vm11, 0.0, %v270_v23 }
  0xae   : > { %306 = vrot.lane.b32.xlu2 %v277_v24, %s780_s11  ;;  %v356_v27 = vrot.slane %v277_v24, 4  ;;  %v355_v34 = vrot.slane %v276_v26, 4 }
  0xb1   : > { %v287_v25 = vld.sshfl [vmem:[#allocation1 + $0x10] sm:$0xff pattern:$0x75316420] }
  0xb2   : > { %338 = vst [vmem:[#allocation1 + $0x10] ss:$2 sm:$0xff] %v206_v9 }
  0xb3   : > { %404 = vrot.lane.b32.xlu0 %v276_v26, %s781_s17 }
  0xb4   : > { %v286_v28 = vld.sshfl [vmem:[#allocation1 + $0x8] sm:$0xff pattern:$0x75316420]  ;;  %v285_v29 = vld.sshfl [vmem:[#allocation1] sm:$0xff pattern:$0x75316420] }
  0xb5   : > { %406 = vrot.lane.b32.xlu1 %v277_v24, %s781_s17  ;;  %336 = vst [vmem:[#allocation1] ss:$2 sm:$0xff] %v205_v10  ;;  %s510_s17 = sshll.u32 %s507_s10, 4  ;;  %s511_s17 = int_to_ptr.hbm [resolvable:$true] %s510_s17 }
  0xb6   : > { %360 = vrot.lane.b32.xlu2 %v356_v27, %s782_s19 }
  0xb9   : > { %v341_v31 = vld.sshfl [vmem:[#allocation1 + $0x10] sm:$0xff pattern:$0x75316420] }
  0xba   : > { %387 = vst [vmem:[#allocation1 + $0x11] ss:$2 sm:$0xff] %v206_v9 }
  0xbb   : > { %362 = vrot.lane.b32.xlu0 %v357_v30, %s782_s19 }
  0xbc   : > { %v339_v32 = vld.sshfl [vmem:[#allocation1] sm:$0xff pattern:$0x75316420]  ;;  %v340_v33 = vld.sshfl [vmem:[#allocation1 + $0x8] sm:$0xff pattern:$0x75316420] }
  0xbd   : > { %304 = vrot.lane.b32.xlu1 %v276_v26, %s780_s11  ;;  %385 = vst [vmem:[#allocation1 + $0x1] ss:$2 sm:$0xff] %v205_v10  ;;  %s508_s11 = sshll.u32 %s180_s7, 4  ;;  %s509_s11 = int_to_ptr.vmem [resolvable:$true] %s508_s11 }
  0xbe   : > { %290 = vrot.lane.b32.xlu2 %v286_v28, %s783_s20 }
  0xc1   : > { %v390_v35 = vld.sshfl [vmem:[#allocation1 + $0x10] sm:$0xff pattern:$0x75316420] }
  0xc3   : > { %292 = vrot.lane.b32.xlu0 %v287_v25, %s783_s20 }
  0xc4   : > { %v388_v36 = vld.sshfl [vmem:[#allocation1] sm:$0xff pattern:$0x75316420]  ;;  %v389_v37 = vld.sshfl [vmem:[#allocation1 + $0x8] sm:$0xff pattern:$0x75316420] }
  0xc5   : > { %358 = vrot.lane.b32.xlu1 %v355_v34, %s782_s19  ;;  %s720_s19 = sshra.s32 %s511_s17, 4  ;;  %s721_s19 = int_to_ptr.hbm [resolvable:$true] %s720_s19 }
  0xc6   : > { %342 = vrot.lane.b32.xlu2 %v339_v32, %s784_s24  ;;  %p727_p3 = scmp.lt.s32.totalorder %s721_s19, %s931_s3 }
  0xcb   : > { %346 = vrot.lane.b32.xlu0 %v341_v31, %s784_s24 }
  0xcd   : > { %288 = vrot.lane.b32.xlu1 %v285_v29, %s783_s20  ;;  %s722_s20 = scalar_lea.hbm %s721_s19, 32 }
  0xce   : > { %344 = vrot.lane.b32.xlu2 %v340_v33, %s784_s24  ;;  %p723_p0 = scmp.ne.s32.totalorder %s721_s19, %s722_s20 }
  0xd0   : > { %p724_p1 = pnand %p723_p0, %p848_p5 }
  0xd2   : > { %p725_p2 = pneg %p724_p1 }
  0xd3   : > { %395 = vrot.lane.b32.xlu0 %v390_v35, %s785_s25 }
  0xd5   : > { %391 = vrot.lane.b32.xlu1 %v388_v36, %s785_s25 }
  0xd6   : > { %393 = vrot.lane.b32.xlu2 %v389_v37, %s785_s25  ;;  %v606_v37 = vld [vmem:[#allocation4] sm:$0xff] }
  0xdb   : > { %327 = vrot.lane.b32.xlu0 %v322_v38, %s786_s26 }
  0xdd   : > { %323 = vrot.lane.b32.xlu1 %v320_v39, %s786_s26 }
  0xde   : > { %325 = vrot.lane.b32.xlu2 %v321_v40, %s786_s26  ;;  %s726_s26 = scalar_lea.hbm %s931_s3, 64 }
  0xdf   : > { %p728_p4 = scmp.lt.s32.totalorder %s726_s26, %s722_s20 }
  0xe1   : > { %p729_p7 = por %p728_p4, %p727_p3 }
  0xe3   : > { %p730_p8 = pnand %p729_p7, %p725_p2 }
  0xe5   : > { %439 = vperm.xlu1 %673, %v435_v11  }
  0xe6   : > { %444 = vperm.xlu2 %674, %v436_v12  }
  0xfe   : > { %v374_v41 = vpop.permute.xlu2 %373 }
 0x108   : > { %v307_v42 = vpop.permute.xlu2 %306 }
 0x110   : > { %v361_v43 = vpop.permute.xlu2 %360 }
 0x115   : > { %v376_v44 = vpop.permute.xlu0 %375 }
 0x116   : > { %v379_v45 = vsel %vm377_vm12, %v374_v41, %v376_v44 }
 0x117   : > { %383 = vst [vmem:[#allocation3 + $0x20] sm:$0xf] %v379_v45  ;;  %v372_v46 = vpop.permute.xlu1 %371 }
 0x118   : > { %v291_v47 = vpop.permute.xlu2 %290  ;;  %v378_v48 = vsel %vm377_vm12, %v372_v46, %v374_v41 }
 0x119   : > { %382 = vst [vmem:[#allocation3 + $0x8] sm:$0xf] %v378_v48 }
 0x11d   : > { %v309_v49 = vpop.permute.xlu0 %308 }
 0x11e   : > { %v312_v50 = vsel %vm310_vm13, %v307_v42, %v309_v49 }
 0x11f   : > { %316 = vst [vmem:[#allocation3 + $0x10] sm:$0xf] %v312_v50  ;;  %v409_v51 = vpop.permute.xlu1 %408 }
 0x120   : > { %v343_v52 = vpop.permute.xlu2 %342 }
 0x125   : > { %v405_v53 = vpop.permute.xlu0 %404 }
 0x127   : > { %v407_v54 = vpop.permute.xlu1 %406 }
 0x128   : > { %v345_v55 = vpop.permute.xlu2 %344  ;;  %v411_v56 = vsel %vm410_vm14, %v405_v53, %v407_v54  ;;  %v412_v57 = vsel %vm410_vm14, %v407_v54, %v409_v51 }
 0x129   : > { %v349_v58 = vsel %vm348_vm15, %v343_v52, %v345_v55  ;;  %415 = vst [vmem:[#allocation3 + $0x40] sm:$0xf] %v411_v56 }
 0x12a   : > { %353 = vst [vmem:[#allocation3 + $0x48] sm:$0xf] %v349_v58 }
 0x12b   : > { %416 = vst [vmem:[#allocation3 + $0x38] sm:$0xf] %v412_v57 }
 0x12d   : > { %v363_v59 = vpop.permute.xlu0 %362 }
 0x12e   : > { %v366_v60 = vsel %vm364_vm0, %v361_v43, %v363_v59 }
 0x12f   : > { %370 = vst [vmem:[#allocation3 + $0x28] sm:$0xf0] %v366_v60  ;;  %v305_v61 = vpop.permute.xlu1 %304 }
 0x130   : > { %v311_v62 = vsel %vm310_vm13, %v305_v61, %v307_v42  ;;  %v427_v63 = vld [vmem:[#allocation3 + $0x40] sm:$0xf]  ;;  %v394_v16 = vpop.permute.xlu2 %393 }
 0x131   : > { %315 = vst [vmem:[#allocation3 + $0x18] sm:$0xf] %v311_v62  ;;  %v433_v0 = vpack.c.bf16 %v427_v63, %v427_v63 }
 0x132   : > { %v428_v1 = vld [vmem:[#allocation3 + $0x38] sm:$0xf] }
 0x133   : > { %v458_v2 = vsel %vm456_vm1, %v433_v0, 0  ;;  %v434_v3 = vpack.c.bf16 %v428_v1, %v428_v1 }
 0x134   : > { %468 = vmatpush.bf16.msra.mxu0 %v458_v2 }
 0x135   : > { %v461_v4 = vsel %vm456_vm1, %v434_v3, 0  ;;  %v293_v5 = vpop.permute.xlu0 %292 }
 0x136   : > { %482 = vmatpush.bf16.msra.mxu1 %v461_v4  ;;  %v296_v6 = vsel %vm294_vm2, %v291_v47, %v293_v5 }
 0x137   : > { %300 = vst [vmem:[#allocation3] sm:$0xf0] %v296_v6  ;;  %v359_v7 = vpop.permute.xlu1 %358 }
 0x138   : > { %v365_v8 = vsel %vm364_vm0, %v359_v7, %v361_v43  ;;  %v326_v21 = vpop.permute.xlu2 %325 }
 0x139   : > { %369 = vst [vmem:[#allocation3 + $0x48] sm:$0xf0] %v365_v8 }
 0x13d   : > { %v347_v9 = vpop.permute.xlu0 %346 }
 0x13e   : > { %v350_v10 = vsel %vm348_vm15, %v345_v55, %v347_v9  ;;  %v420_v32 = vld [vmem:[#allocation3] sm:$0xff] }
 0x13f   : > { %354 = vst [vmem:[#allocation3 + $0x28] sm:$0xf] %v350_v10  ;;  %v289_v13 = vpop.permute.xlu1 %288 }
 0x140   : > { %v295_v15 = vsel %vm294_vm2, %v289_v13, %v291_v47  ;;  %v423_v29 = vld [vmem:[#allocation3 + $0x48] sm:$0xff]  ;;  %v445_v44 = vpop.permute.xlu2 %444 }
 0x141   : > { %299 = vst [vmem:[#allocation3 + $0x30] sm:$0xf0] %v295_v15 }
 0x145   : > { %v396_v17 = vpop.permute.xlu0 %395 }
 0x146   : > { %v399_v18 = vsel %vm397_vm3, %v394_v16, %v396_v17  ;;  %v424_v24 = vld [vmem:[#allocation3 + $0x28] sm:$0xff] }
 0x147   : > { %403 = vst [vmem:[#allocation3 + $0x20] sm:$0xf0] %v399_v18  ;;  %v392_v19 = vpop.permute.xlu1 %391 }
 0x148   : > { %v398_v20 = vsel %vm397_vm3, %v392_v19, %v394_v16  ;;  %v419_v35 = vld [vmem:[#allocation3 + $0x30] sm:$0xff] }
 0x149   : > { %402 = vst [vmem:[#allocation3 + $0x8] sm:$0xf0] %v398_v20 }
 0x14d   : > { %v328_v22 = vpop.permute.xlu0 %327 }
 0x14e   : > { %v331_v23 = vsel %vm329_vm4, %v326_v21, %v328_v22  ;;  %v426_v25 = vld [vmem:[#allocation3 + $0x20] sm:$0xff] }
 0x14f   : > { %335 = vst [vmem:[#allocation3 + $0x10] sm:$0xf0] %v331_v23  ;;  %v324_v26 = vpop.permute.xlu1 %323  ;;  %v432_v27 = vpack.c.bf16 %v426_v25, %v424_v24 }
 0x150   : > { %v330_v28 = vsel %vm329_vm4, %v324_v26, %v326_v21  ;;  %v425_v30 = vld [vmem:[#allocation3 + $0x8] sm:$0xff] }
 0x151   : > { %334 = vst [vmem:[#allocation3 + $0x18] sm:$0xf0] %v330_v28  ;;  %483 = vmatpush.bf16.msra.mxu1 %v432_v27  ;;  %v431_v31 = vpack.c.bf16 %v425_v30, %v423_v29 }
 0x153   : > { %469 = vmatpush.bf16.msra.mxu0 %v431_v31 }
 0x156   : > { %v422_v33 = vld [vmem:[#allocation3 + $0x10] sm:$0xff] }
 0x157   : > { %v430_v34 = vpack.c.bf16 %v422_v33, %v420_v32  ;;  %v440_v39 = vpop.permute.xlu1 %439 }
 0x158   : > { %v421_v36 = vld [vmem:[#allocation3 + $0x18] sm:$0xff] }
 0x159   : > { %484 = vmatpush.bf16.msra.mxu1 %v430_v34  ;;  %v429_v38 = vpack.c.bf16 %v421_v36, %v419_v35 }
 0x15b   : > { %470 = vmatpush.bf16.msra.mxu0 %v429_v38 }
 0x15c   : > { %599 = vmatmul.msk.bf16.vlgmr.msra.gmra.mxu1 %vm452_vm5, %v606_v37 }
 0x15e   : > { %598 = vmatmul.msk.bf16.vlgmr.msra.gmra.mxu0 %vm452_vm5, %v606_v37 }
 0x1d9   : > { %v486_v40 = vpop.f32.mrf.mxu1 }
 0x1da   : > { %v487_v41 = vadd.f32 %v486_v40, %v440_v39 }
 0x1db   : > { %v472_v42 = vpop.f32.mrf.mxu0 }
 0x1dc   : > { %492 = vst [vmem:[%s180_s7 + $0x8] sm:$0xff] %v487_v41  ;;  %v473_v43 = vadd.f32 %v472_v42, %v440_v39 }
 0x1de   : > { %491 = vst [vmem:[%s180_s7] sm:$0xff] %v473_v43 }
 0x1e1   : > { %v488_v45 = vpop.f32.mrf.mxu1 }
 0x1e2   : > { %v489_v46 = vadd.f32 %v488_v45, %v445_v44 }
 0x1e3   : > { %v474_v47 = vpop.f32.mrf.mxu0 }
 0x1e4   : > { %494 = vst [vmem:[%s180_s7 + $0x18] sm:$0xff] %v489_v46  ;;  %v475_v48 = vadd.f32 %v474_v47, %v445_v44 }
 0x1e6   : > { %493 = vst [vmem:[%s180_s7 + $0x10] sm:$0xff] %v475_v48 }
 0x1e7   : > { %733 = shalt.err (!%p730_p8)
}
 0x1e8   : > { %s788_s29 = smov 256   ;;  %s789_s30 = smov 16  }
 0x1e9   : > { %612 = dma.vmem_to_hbm [thread:$0]  (%p848_p5), %s509_s11, 512, %s511_s17, %s496_s16, %s788_s29, %s788_s29, %s789_s30  }
 0x1ea PF: > { %p624_p9 = scmp.ge.s32.totalorder %s772_s15, 2  ;;  %s525_s4 = sand.u32 1, %s760_s12  }
 0x1eb   : > { %s526_s5 = scalar_lea.sflag [#allocation6], %s525_s4 }
 0x1ec   : > { %p619_p10 = pnand %p624_p9, %p852_p6 }
 0x1ee   : > { %p620_p11 = pneg %p619_p10 }
 0x1f0   : > { %755 = dma.done.wait (%p620_p11), %s526_s5, 512  }
 0x1f1   : > { %757 = vsyncadd (%p620_p11), %s526_s5, 4294966784  ;;  %p14_p12 = scmp.ge.s32.totalorder %s835_s18, 4   ;;  %s934_s12 = smov %s764_s13 }
 0x1f2   : > { %s935_s13 = smov %s768_s14  ;;  %s936_s14 = smov %s846_s21 }
 0x1f3   : > { %s937_s15 = smov %s835_s18  ;;  %16 = sbr.rel (!%p14_p12) target bundleno = 4 (0x4), region = 79 }
 0x1f8   :  { %532 = vsyncpa [#allocation5], 1 }
 0x1f9   :  { %534 = vsyncpa [#allocation5 + $0x1], 1 }
 0x1fa   :  { %535 = vsyncpa [#allocation6], 1 }
 0x1fb   :  { %537 = vsyncpa [#allocation6 + $0x1], 1 }

</bundles_post_ra>
